<compile_context>
chip_gen: v7x
topology: tpu7x:2x2x1
jax: 0.10.0
libtpu: 0.0.40
codegen_flags: <defaults>
</compile_context>

<pallas_src>
import functools

import jax
import jax.numpy as jnp
from jax.experimental import pallas as pl
from jax.experimental.pallas import tpu as pltpu


# ------------------------------ tiling config ------------------------------

TM_MAX = 512       # max node-row tile (output rows per grid step)
TK_MAX = 1024      # max reduction tile over the neighbor (source-node) axis
LANE = 128         # lane width: pad all feature dims to a multiple of this
VMEM_LIMIT_BYTES = 48 * 1024 * 1024


def _round_up(x, m):
    return ((x + m - 1) // m) * m


def _pick_tile(n_padded, max_tile):
    """Largest multiple of 128 that divides n_padded and is <= max_tile."""
    best = LANE
    t = 2 * LANE
    while t <= max_tile:
        if n_padded % t == 0:
            best = t
        t += LANE
    return best


# ------------------------------ Pallas kernel ------------------------------

def _sage_layer_kernel(adj_ref, xs_ref, xr_ref, invdeg_ref, wl_ref, wr_ref,
                       b_ref, o_ref, acc_ref, *, apply_relu: bool):
    """One SAGEConv layer over grid (row tile i, reduction tile k).

    adj_ref    : [TM, TK]  bf16  edge-count adjacency tile (dst rows, src cols)
    xs_ref     : [TK, Fp]  bf16  streamed source-node features (varies with k)
    xr_ref     : [TM, Fp]  bf16  root-node features for this row tile
    invdeg_ref : [TM, 1]   f32   exact 1/deg per destination row
    wl_ref     : [Fp, Hp]  bf16  W_l (applied to mean aggregation)
    wr_ref     : [Fp, Hp]  bf16  W_r (applied to root features)
    b_ref      : [1, Hp]   f32   bias (lin_l only, PyG default)
    o_ref      : [TM, Hp]  out dtype (bf16 for layer 1, f32 for layer 2)
    acc_ref    : [TM, Fp]  f32   aggregation accumulator scratch
    """
    k = pl.program_id(1)

    # neighbor-sum partial: A[i-tile, k-tile] @ x[k-tile]  (bf16 MXU, f32 acc)
    contrib = jnp.dot(adj_ref[...], xs_ref[...],
                      preferred_element_type=jnp.float32)

    @pl.when(k == 0)
    def _():
        acc_ref[...] = contrib            # direct write: no zero-fill pass

    @pl.when(k != 0)
    def _():
        acc_ref[...] += contrib

    @pl.when(k == pl.num_programs(1) - 1)
    def _():
        # exact f32 mean normalization, then bf16 for the MXU weight matmuls
        agg = (acc_ref[...] * invdeg_ref[...]).astype(jnp.bfloat16)
        out = jnp.dot(agg, wl_ref[...], preferred_element_type=jnp.float32)
        out = out + jnp.dot(xr_ref[...], wr_ref[...],
                            preferred_element_type=jnp.float32)
        out = out + b_ref[...]
        if apply_relu:
            out = jnp.maximum(out, 0.0)
        o_ref[...] = out.astype(o_ref.dtype)


def sage_layer(adj, x, inv_deg, w_l, w_r, b, *, apply_relu, out_dtype, tm, tk):
    """adj: [Np,Np] bf16; x: [Np,Fp] bf16; inv_deg: [Np,1] f32;
    w_l/w_r: [Fp,Hp] bf16; b: [1,Hp] f32.  Np % tm == 0, Np % tk == 0,
    Fp/Hp multiples of 128."""
    np_, fp = x.shape
    hp = w_l.shape[1]
    assert np_ % tm == 0 and np_ % tk == 0
    assert fp % LANE == 0 and hp % LANE == 0

    kernel = functools.partial(_sage_layer_kernel, apply_relu=apply_relu)
    # NOTE: W/bias blocks are grid-invariant; Pallas re-uses them without
    # re-DMA.  (pipeline_mode=pl.Buffered(1) could also drop their second
    # buffer on v7x if VMEM headroom ever becomes tight.)
    return pl.pallas_call(
        kernel,
        out_shape=jax.ShapeDtypeStruct((np_, hp), out_dtype),
        grid_spec=pltpu.PrefetchScalarGridSpec(
            num_scalar_prefetch=0,
            grid=(np_ // tm, np_ // tk),
            in_specs=[
                pl.BlockSpec((tm, tk), lambda i, k: (i, k)),   # adj tile
                pl.BlockSpec((tk, fp), lambda i, k: (k, 0)),   # x (stream)
                pl.BlockSpec((tm, fp), lambda i, k: (i, 0)),   # x (root)
                pl.BlockSpec((tm, 1), lambda i, k: (i, 0)),    # 1/deg
                pl.BlockSpec((fp, hp), lambda i, k: (0, 0)),   # W_l
                pl.BlockSpec((fp, hp), lambda i, k: (0, 0)),   # W_r
                pl.BlockSpec((1, hp), lambda i, k: (0, 0)),    # bias
            ],
            out_specs=pl.BlockSpec((tm, hp), lambda i, k: (i, 0)),
            scratch_shapes=[pltpu.VMEM((tm, fp), jnp.float32)],
        ),
        compiler_params=pltpu.CompilerParams(
            dimension_semantics=("parallel", "arbitrary"),
            vmem_limit_bytes=VMEM_LIMIT_BYTES),
    )(adj, x, x, inv_deg, w_l, w_r, b)


# -------------------------------- glue (JAX) --------------------------------

def build_adj_and_inv_deg(edge_index, padded_nodes):
    """Edge-count adjacency (src -> dst) built directly in bf16, plus exact
    f32 inverse degrees (0 for isolated / padded nodes)."""
    src, dst = edge_index[0], edge_index[1]
    adj = jnp.zeros((padded_nodes, padded_nodes), jnp.bfloat16)
    adj = adj.at[dst, src].add(jnp.ones(src.shape, jnp.bfloat16))
    deg = jnp.zeros((padded_nodes,), jnp.float32).at[dst].add(1.0)
    inv_deg = jnp.where(deg > 0, 1.0 / jnp.maximum(deg, 1.0), 0.0)
    return adj, inv_deg.reshape(padded_nodes, 1)


def _pad2(a, rows, cols):
    out = jnp.zeros((rows, cols), a.dtype)
    return out.at[:a.shape[0], :a.shape[1]].set(a)


def init_sage_params(key, in_channels, hidden_channels, out_channels):
    """Glorot-uniform-like init matching SAGEConv shapes (bias on lin_l only)."""
    def glorot(k, shape):
        fan_in, fan_out = shape
        limit = jnp.sqrt(6.0 / (fan_in + fan_out))
        return jax.random.uniform(k, shape, jnp.float32, -limit, limit)

    k1, k2, k3, k4 = jax.random.split(key, 4)
    return {
        "w1_l": glorot(k1, (in_channels, hidden_channels)),
        "w1_r": glorot(k2, (in_channels, hidden_channels)),
        "b1_l": jnp.zeros((1, hidden_channels), jnp.float32),
        "w2_l": glorot(k3, (hidden_channels, out_channels)),
        "w2_r": glorot(k4, (hidden_channels, out_channels)),
        "b2_l": jnp.zeros((1, out_channels), jnp.float32),
    }


@jax.jit
def sage_forward(params, x, edge_index):
    n, fin = x.shape
    hidden = params["w1_l"].shape[1]
    out_ch = params["w2_l"].shape[1]

    # padded sizes: nodes to a multiple of 128 only (no forced TK-sized pad)
    np_ = _round_up(max(n, LANE), LANE)
    fp1 = _round_up(fin, LANE)
    hp = _round_up(hidden, LANE)
    op = _round_up(out_ch, LANE)

    tm = _pick_tile(np_, TM_MAX)
    tk = _pick_tile(np_, TK_MAX)
    # keep >= 2 row tiles when possible so the "parallel" axis can shard
    # across both v7x TensorCores
    if np_ // tm < 2 and tm >= 2 * LANE:
        tm //= 2

    # adjacency + exact 1/deg built once per forward, shared by both layers
    adj, inv_deg = build_adj_and_inv_deg(edge_index, np_)

    x_p = _pad2(x.astype(jnp.bfloat16), np_, fp1)

    # layer 1 (ReLU fused, bf16 output written directly by the kernel)
    w1_l = _pad2(params["w1_l"], fp1, hp).astype(jnp.bfloat16)
    w1_r = _pad2(params["w1_r"], fp1, hp).astype(jnp.bfloat16)
    b1 = _pad2(params["b1_l"], 1, hp)
    h = sage_layer(adj, x_p, inv_deg, w1_l, w1_r, b1,
                   apply_relu=True, out_dtype=jnp.bfloat16, tm=tm, tk=tk)

    # layer 2 (f32 output)
    w2_l = _pad2(params["w2_l"], hp, op).astype(jnp.bfloat16)
    w2_r = _pad2(params["w2_r"], hp, op).astype(jnp.bfloat16)
    b2 = _pad2(params["b2_l"], 1, op)
    out = sage_layer(adj, h, inv_deg, w2_l, w2_r, b2,
                     apply_relu=False, out_dtype=jnp.float32, tm=tm, tk=tk)

    # padded (nonexistent) rows only contain the bias — this slice is required
    return out[:n, :out_ch]


def sage_reference(params, x, edge_index):
    """Pure-JAX f32 reference with identical SAGEConv mean semantics."""
    n = x.shape[0]
    src, dst = edge_index[0], edge_index[1]
    adj = jnp.zeros((n, n), jnp.float32).at[dst, src].add(1.0)
    deg = jnp.sum(adj, axis=1, keepdims=True)

    def conv(xin, wl, wr, b):
        agg = (adj @ xin) / jnp.maximum(deg, 1.0)
        return agg @ wl + xin @ wr + b

    h = jnp.maximum(conv(x, params["w1_l"], params["w1_r"], params["b1_l"]),
                    0.0)
    return conv(h, params["w2_l"], params["w2_r"], params["b2_l"])


# ----------------------------------- main -----------------------------------

if __name__ == "__main__":
    key = jax.random.PRNGKey(0)
    k_x, k_e, k_p = jax.random.split(key, 3)

    num_nodes = 8
    in_channels = 4
    hidden_channels = 32
    out_channels = 16
    num_edges = 16

    x = jax.random.normal(k_x, (num_nodes, in_channels), jnp.float32)
    edge_index = jax.random.randint(k_e, (2, num_edges), 0, num_nodes,
                                    dtype=jnp.int32)

    params = init_sage_params(k_p, in_channels, hidden_channels, out_channels)

    out = sage_forward(params, x, edge_index)
    out = jax.block_until_ready(out)
    assert out.shape == (num_nodes, out_channels)

    ref = sage_reference(params, x, edge_index)
    max_err = float(jnp.max(jnp.abs(out - ref)))
    assert max_err < 5e-2, f"max abs error vs f32 reference: {max_err}"

    print("KERNEL_OK")
</pallas_src>

<mosaic_0001>
module attributes {stable_mosaic.version = 11 : i64} {
  func.func private @main(%arg0: i32) attributes {dimension_semantics = [#tpu.dimension_semantics<core_parallel>], iteration_bounds = array<i64: 2>, tpu.core_type = #tpu.core_type<sc_scalar_subcore>, window_params = []} {
    return
  }
}

module attributes {stable_mosaic.version = 11 : i64} {
  func.func private @main(%arg0: i32) attributes {dimension_semantics = [#tpu.dimension_semantics<core_parallel>], iteration_bounds = array<i64: 2>, tpu.core_type = #tpu.core_type<sc_scalar_subcore>, window_params = []} {
    return
  }
}

module attributes {stable_mosaic.version = 11 : i64} {
  func.func @_sage_layer_kernel(%arg0: i32, %arg1: i32, %arg2: memref<128x128xbf16, #tpu.memory_space<vmem>>, %arg3: memref<128x128xbf16, #tpu.memory_space<vmem>>, %arg4: memref<128x128xbf16, #tpu.memory_space<vmem>>, %arg5: memref<128x1xf32, #tpu.memory_space<vmem>>, %arg6: memref<128x128xbf16, #tpu.memory_space<vmem>>, %arg7: memref<128x128xbf16, #tpu.memory_space<vmem>>, %arg8: memref<1x128xf32, #tpu.memory_space<vmem>>, %arg9: memref<128x128xf32, #tpu.memory_space<vmem>>, %arg10: memref<128x128xf32, #tpu.memory_space<vmem>>) attributes {dimension_semantics = [#tpu.dimension_semantics<parallel>, #tpu.dimension_semantics<arbitrary>], iteration_bounds = array<i64: 1, 1>, scalar_prefetch = 0 : i64, scratch_operands = 1 : i64, tpu.core_type = #tpu.core_type<tc>, window_params = [{transform_indices = @transform_0, window_bounds = array<i64: 128, 128>}, {transform_indices = @transform_1, window_bounds = array<i64: 128, 128>}, {transform_indices = @transform_2, window_bounds = array<i64: 128, 128>}, {transform_indices = @transform_3, window_bounds = array<i64: 128, 1>}, {pipeline_mode = #tpu.pipeline_mode<synchronous>, transform_indices = @transform_4, window_bounds = array<i64: 128, 128>}, {pipeline_mode = #tpu.pipeline_mode<synchronous>, transform_indices = @transform_5, window_bounds = array<i64: 128, 128>}, {pipeline_mode = #tpu.pipeline_mode<synchronous>, transform_indices = @transform_6, window_bounds = array<i64: 1, 128>}, {transform_indices = @transform_7, window_bounds = array<i64: 128, 128>}]} {
    %c0 = arith.constant 0 : index
    %c0_0 = arith.constant 0 : index
    %0 = vector.load %arg2[%c0, %c0_0] : memref<128x128xbf16, #tpu.memory_space<vmem>>, vector<128x128xbf16>
    %c0_1 = arith.constant 0 : index
    %c0_2 = arith.constant 0 : index
    %1 = vector.load %arg3[%c0_1, %c0_2] : memref<128x128xbf16, #tpu.memory_space<vmem>>, vector<128x128xbf16>
    %cst = arith.constant dense<0.000000e+00> : vector<128x128xf32>
    %2 = tpu.matmul %0, %1, %cst {dimension_numbers = #tpu.dot_dimension_numbers<[1], [0], [0], [1], [0, 0, 1, 1], [], []>} : vector<128x128xbf16>, vector<128x128xbf16>, vector<128x128xf32> -> vector<128x128xf32>
    %c0_i32 = arith.constant 0 : i32
    %3 = arith.cmpi eq, %arg1, %c0_i32 : i32
    %4 = arith.extui %3 : i1 to i32
    %c0_i32_3 = arith.constant 0 : i32
    %5 = arith.cmpi ne, %4, %c0_i32_3 : i32
    scf.if %5 {
      %c0_8 = arith.constant 0 : index
      %c0_9 = arith.constant 0 : index
      %12 = vector.load %arg10[%c0_8, %c0_9] : memref<128x128xf32, #tpu.memory_space<vmem>>, vector<128x128xf32>
      tpu.vector_store %arg10[%c0_8, %c0_9], %2 {strides = array<i32>} : memref<128x128xf32, #tpu.memory_space<vmem>>, vector<128x128xf32>,
    } else {
    }
    %c0_i32_4 = arith.constant 0 : i32
    %6 = arith.cmpi ne, %arg1, %c0_i32_4 : i32
    %7 = arith.extui %6 : i1 to i32
    %c0_i32_5 = arith.constant 0 : i32
    %8 = arith.cmpi ne, %7, %c0_i32_5 : i32
    scf.if %8 {
      %c0_8 = arith.constant 0 : index
      %c0_9 = arith.constant 0 : index
      %12 = vector.load %arg10[%c0_8, %c0_9] : memref<128x128xf32, #tpu.memory_space<vmem>>, vector<128x128xf32>
      %13 = arith.addf %12, %2 : vector<128x128xf32>
      %c0_10 = arith.constant 0 : index
      %c0_11 = arith.constant 0 : index
      %14 = vector.load %arg10[%c0_10, %c0_11] : memref<128x128xf32, #tpu.memory_space<vmem>>, vector<128x128xf32>
      tpu.vector_store %arg10[%c0_10, %c0_11], %13 {strides = array<i32>} : memref<128x128xf32, #tpu.memory_space<vmem>>, vector<128x128xf32>,
    } else {
    }
    %c0_i32_6 = arith.constant 0 : i32
    %9 = arith.cmpi eq, %arg1, %c0_i32_6 : i32
    %10 = arith.extui %9 : i1 to i32
    %c0_i32_7 = arith.constant 0 : i32
    %11 = arith.cmpi ne, %10, %c0_i32_7 : i32
    scf.if %11 {
      %c0_8 = arith.constant 0 : index
      %c0_9 = arith.constant 0 : index
      %12 = vector.load %arg10[%c0_8, %c0_9] : memref<128x128xf32, #tpu.memory_space<vmem>>, vector<128x128xf32>
      %c0_10 = arith.constant 0 : index
      %c0_11 = arith.constant 0 : index
      %13 = vector.load %arg5[%c0_10, %c0_11] : memref<128x1xf32, #tpu.memory_space<vmem>>, vector<128x1xf32>
      %14 = vector.broadcast %13 : vector<128x1xf32> to vector<128x128xf32>
      %15 = arith.mulf %12, %14 : vector<128x128xf32>
      %16 = arith.truncf %15 : vector<128x128xf32> to vector<128x128xbf16>
      %c0_12 = arith.constant 0 : index
      %c0_13 = arith.constant 0 : index
      %17 = vector.load %arg6[%c0_12, %c0_13] : memref<128x128xbf16, #tpu.memory_space<vmem>>, vector<128x128xbf16>
      %cst_14 = arith.constant dense<0.000000e+00> : vector<128x128xf32>
      %18 = tpu.matmul %16, %17, %cst_14 {dimension_numbers = #tpu.dot_dimension_numbers<[1], [0], [0], [1], [0, 0, 1, 1], [], []>} : vector<128x128xbf16>, vector<128x128xbf16>, vector<128x128xf32> -> vector<128x128xf32>
      %c0_15 = arith.constant 0 : index
      %c0_16 = arith.constant 0 : index
      %19 = vector.load %arg4[%c0_15, %c0_16] : memref<128x128xbf16, #tpu.memory_space<vmem>>, vector<128x128xbf16>
      %c0_17 = arith.constant 0 : index
      %c0_18 = arith.constant 0 : index
      %20 = vector.load %arg7[%c0_17, %c0_18] : memref<128x128xbf16, #tpu.memory_space<vmem>>, vector<128x128xbf16>
      %cst_19 = arith.constant dense<0.000000e+00> : vector<128x128xf32>
      %21 = tpu.matmul %19, %20, %cst_19 {dimension_numbers = #tpu.dot_dimension_numbers<[1], [0], [0], [1], [0, 0, 1, 1], [], []>} : vector<128x128xbf16>, vector<128x128xbf16>, vector<128x128xf32> -> vector<128x128xf32>
      %22 = arith.addf %18, %21 : vector<128x128xf32>
      %c0_20 = arith.constant 0 : index
      %c0_21 = arith.constant 0 : index
      %23 = vector.load %arg8[%c0_20, %c0_21] : memref<1x128xf32, #tpu.memory_space<vmem>>, vector<1x128xf32>
      %24 = vector.broadcast %23 : vector<1x128xf32> to vector<128x128xf32>
      %25 = arith.addf %22, %24 : vector<128x128xf32>
      %c0_22 = arith.constant 0 : index
      %c0_23 = arith.constant 0 : index
      %26 = vector.load %arg9[%c0_22, %c0_23] : memref<128x128xf32, #tpu.memory_space<vmem>>, vector<128x128xf32>
      tpu.vector_store %arg9[%c0_22, %c0_23], %25 {strides = array<i32>} : memref<128x128xf32, #tpu.memory_space<vmem>>, vector<128x128xf32>,
    } else {
    }
    return
  }
  func.func @transform_0(%arg0: i32, %arg1: i32) -> (i32, i32) {
    %c0_i32 = arith.constant 0 : i32
    return %arg0, %arg1 : i32, i32
  }
  func.func @transform_1(%arg0: i32, %arg1: i32) -> (i32, i32) {
    %c0_i32 = arith.constant 0 : i32
    %c0_i32_0 = arith.constant 0 : i32
    return %arg1, %c0_i32 : i32, i32
  }
  func.func @transform_2(%arg0: i32, %arg1: i32) -> (i32, i32) {
    %c0_i32 = arith.constant 0 : i32
    %c0_i32_0 = arith.constant 0 : i32
    return %arg0, %c0_i32 : i32, i32
  }
  func.func @transform_3(%arg0: i32, %arg1: i32) -> (i32, i32) {
    %c0_i32 = arith.constant 0 : i32
    %c0_i32_0 = arith.constant 0 : i32
    return %arg0, %c0_i32 : i32, i32
  }
  func.func @transform_4(%arg0: i32, %arg1: i32) -> (i32, i32) {
    %c0_i32 = arith.constant 0 : i32
    %c0_i32_0 = arith.constant 0 : i32
    %c0_i32_1 = arith.constant 0 : i32
    return %c0_i32, %c0_i32_0 : i32, i32
  }
  func.func @transform_5(%arg0: i32, %arg1: i32) -> (i32, i32) {
    %c0_i32 = arith.constant 0 : i32
    %c0_i32_0 = arith.constant 0 : i32
    %c0_i32_1 = arith.constant 0 : i32
    return %c0_i32, %c0_i32_0 : i32, i32
  }
  func.func @transform_6(%arg0: i32, %arg1: i32) -> (i32, i32) {
    %c0_i32 = arith.constant 0 : i32
    %c0_i32_0 = arith.constant 0 : i32
    %c0_i32_1 = arith.constant 0 : i32
    return %c0_i32, %c0_i32_0 : i32, i32
  }
  func.func @transform_7(%arg0: i32, %arg1: i32) -> (i32, i32) {
    %c0_i32 = arith.constant 0 : i32
    %c0_i32_0 = arith.constant 0 : i32
    return %arg0, %c0_i32 : i32, i32
  }
}

module attributes {stable_mosaic.version = 11 : i64} {
  func.func @_sage_layer_kernel(%arg0: i32, %arg1: i32, %arg2: memref<128x128xbf16, #tpu.memory_space<vmem>>, %arg3: memref<128x128xbf16, #tpu.memory_space<vmem>>, %arg4: memref<128x128xbf16, #tpu.memory_space<vmem>>, %arg5: memref<128x1xf32, #tpu.memory_space<vmem>>, %arg6: memref<128x128xbf16, #tpu.memory_space<vmem>>, %arg7: memref<128x128xbf16, #tpu.memory_space<vmem>>, %arg8: memref<1x128xf32, #tpu.memory_space<vmem>>, %arg9: memref<128x128xbf16, #tpu.memory_space<vmem>>, %arg10: memref<128x128xf32, #tpu.memory_space<vmem>>) attributes {dimension_semantics = [#tpu.dimension_semantics<parallel>, #tpu.dimension_semantics<arbitrary>], iteration_bounds = array<i64: 1, 1>, scalar_prefetch = 0 : i64, scratch_operands = 1 : i64, tpu.core_type = #tpu.core_type<tc>, window_params = [{transform_indices = @transform_0, window_bounds = array<i64: 128, 128>}, {transform_indices = @transform_1, window_bounds = array<i64: 128, 128>}, {transform_indices = @transform_2, window_bounds = array<i64: 128, 128>}, {transform_indices = @transform_3, window_bounds = array<i64: 128, 1>}, {pipeline_mode = #tpu.pipeline_mode<synchronous>, transform_indices = @transform_4, window_bounds = array<i64: 128, 128>}, {pipeline_mode = #tpu.pipeline_mode<synchronous>, transform_indices = @transform_5, window_bounds = array<i64: 128, 128>}, {pipeline_mode = #tpu.pipeline_mode<synchronous>, transform_indices = @transform_6, window_bounds = array<i64: 1, 128>}, {transform_indices = @transform_7, window_bounds = array<i64: 128, 128>}]} {
    %c0 = arith.constant 0 : index
    %c0_0 = arith.constant 0 : index
    %0 = vector.load %arg2[%c0, %c0_0] : memref<128x128xbf16, #tpu.memory_space<vmem>>, vector<128x128xbf16>
    %c0_1 = arith.constant 0 : index
    %c0_2 = arith.constant 0 : index
    %1 = vector.load %arg3[%c0_1, %c0_2] : memref<128x128xbf16, #tpu.memory_space<vmem>>, vector<128x128xbf16>
    %cst = arith.constant dense<0.000000e+00> : vector<128x128xf32>
    %2 = tpu.matmul %0, %1, %cst {dimension_numbers = #tpu.dot_dimension_numbers<[1], [0], [0], [1], [0, 0, 1, 1], [], []>} : vector<128x128xbf16>, vector<128x128xbf16>, vector<128x128xf32> -> vector<128x128xf32>
    %c0_i32 = arith.constant 0 : i32
    %3 = arith.cmpi eq, %arg1, %c0_i32 : i32
    %4 = arith.extui %3 : i1 to i32
    %c0_i32_3 = arith.constant 0 : i32
    %5 = arith.cmpi ne, %4, %c0_i32_3 : i32
    scf.if %5 {
      %c0_8 = arith.constant 0 : index
      %c0_9 = arith.constant 0 : index
      %12 = vector.load %arg10[%c0_8, %c0_9] : memref<128x128xf32, #tpu.memory_space<vmem>>, vector<128x128xf32>
      tpu.vector_store %arg10[%c0_8, %c0_9], %2 {strides = array<i32>} : memref<128x128xf32, #tpu.memory_space<vmem>>, vector<128x128xf32>,
    } else {
    }
    %c0_i32_4 = arith.constant 0 : i32
    %6 = arith.cmpi ne, %arg1, %c0_i32_4 : i32
    %7 = arith.extui %6 : i1 to i32
    %c0_i32_5 = arith.constant 0 : i32
    %8 = arith.cmpi ne, %7, %c0_i32_5 : i32
    scf.if %8 {
      %c0_8 = arith.constant 0 : index
      %c0_9 = arith.constant 0 : index
      %12 = vector.load %arg10[%c0_8, %c0_9] : memref<128x128xf32, #tpu.memory_space<vmem>>, vector<128x128xf32>
      %13 = arith.addf %12, %2 : vector<128x128xf32>
      %c0_10 = arith.constant 0 : index
      %c0_11 = arith.constant 0 : index
      %14 = vector.load %arg10[%c0_10, %c0_11] : memref<128x128xf32, #tpu.memory_space<vmem>>, vector<128x128xf32>
      tpu.vector_store %arg10[%c0_10, %c0_11], %13 {strides = array<i32>} : memref<128x128xf32, #tpu.memory_space<vmem>>, vector<128x128xf32>,
    } else {
    }
    %c0_i32_6 = arith.constant 0 : i32
    %9 = arith.cmpi eq, %arg1, %c0_i32_6 : i32
    %10 = arith.extui %9 : i1 to i32
    %c0_i32_7 = arith.constant 0 : i32
    %11 = arith.cmpi ne, %10, %c0_i32_7 : i32
    scf.if %11 {
      %c0_8 = arith.constant 0 : index
      %c0_9 = arith.constant 0 : index
      %12 = vector.load %arg10[%c0_8, %c0_9] : memref<128x128xf32, #tpu.memory_space<vmem>>, vector<128x128xf32>
      %c0_10 = arith.constant 0 : index
      %c0_11 = arith.constant 0 : index
      %13 = vector.load %arg5[%c0_10, %c0_11] : memref<128x1xf32, #tpu.memory_space<vmem>>, vector<128x1xf32>
      %14 = vector.broadcast %13 : vector<128x1xf32> to vector<128x128xf32>
      %15 = arith.mulf %12, %14 : vector<128x128xf32>
      %16 = arith.truncf %15 : vector<128x128xf32> to vector<128x128xbf16>
      %c0_12 = arith.constant 0 : index
      %c0_13 = arith.constant 0 : index
      %17 = vector.load %arg6[%c0_12, %c0_13] : memref<128x128xbf16, #tpu.memory_space<vmem>>, vector<128x128xbf16>
      %cst_14 = arith.constant dense<0.000000e+00> : vector<128x128xf32>
      %18 = tpu.matmul %16, %17, %cst_14 {dimension_numbers = #tpu.dot_dimension_numbers<[1], [0], [0], [1], [0, 0, 1, 1], [], []>} : vector<128x128xbf16>, vector<128x128xbf16>, vector<128x128xf32> -> vector<128x128xf32>
      %c0_15 = arith.constant 0 : index
      %c0_16 = arith.constant 0 : index
      %19 = vector.load %arg4[%c0_15, %c0_16] : memref<128x128xbf16, #tpu.memory_space<vmem>>, vector<128x128xbf16>
      %c0_17 = arith.constant 0 : index
      %c0_18 = arith.constant 0 : index
      %20 = vector.load %arg7[%c0_17, %c0_18] : memref<128x128xbf16, #tpu.memory_space<vmem>>, vector<128x128xbf16>
      %cst_19 = arith.constant dense<0.000000e+00> : vector<128x128xf32>
      %21 = tpu.matmul %19, %20, %cst_19 {dimension_numbers = #tpu.dot_dimension_numbers<[1], [0], [0], [1], [0, 0, 1, 1], [], []>} : vector<128x128xbf16>, vector<128x128xbf16>, vector<128x128xf32> -> vector<128x128xf32>
      %22 = arith.addf %18, %21 : vector<128x128xf32>
      %c0_20 = arith.constant 0 : index
      %c0_21 = arith.constant 0 : index
      %23 = vector.load %arg8[%c0_20, %c0_21] : memref<1x128xf32, #tpu.memory_space<vmem>>, vector<1x128xf32>
      %24 = vector.broadcast %23 : vector<1x128xf32> to vector<128x128xf32>
      %25 = arith.addf %22, %24 : vector<128x128xf32>
      %cst_22 = arith.constant 0.000000e+00 : f32
      %26 = vector.broadcast %cst_22 : f32 to vector<128x128xf32>
      %27 = arith.maximumf %25, %26 : vector<128x128xf32>
      %28 = arith.truncf %27 : vector<128x128xf32> to vector<128x128xbf16>
      %c0_23 = arith.constant 0 : index
      %c0_24 = arith.constant 0 : index
      %29 = vector.load %arg9[%c0_23, %c0_24] : memref<128x128xbf16, #tpu.memory_space<vmem>>, vector<128x128xbf16>
      tpu.vector_store %arg9[%c0_23, %c0_24], %28 {strides = array<i32>} : memref<128x128xbf16, #tpu.memory_space<vmem>>, vector<128x128xbf16>,
    } else {
    }
    return
  }
  func.func @transform_0(%arg0: i32, %arg1: i32) -> (i32, i32) {
    %c0_i32 = arith.constant 0 : i32
    return %arg0, %arg1 : i32, i32
  }
  func.func @transform_1(%arg0: i32, %arg1: i32) -> (i32, i32) {
    %c0_i32 = arith.constant 0 : i32
    %c0_i32_0 = arith.constant 0 : i32
    return %arg1, %c0_i32 : i32, i32
  }
  func.func @transform_2(%arg0: i32, %arg1: i32) -> (i32, i32) {
    %c0_i32 = arith.constant 0 : i32
    %c0_i32_0 = arith.constant 0 : i32
    return %arg0, %c0_i32 : i32, i32
  }
  func.func @transform_3(%arg0: i32, %arg1: i32) -> (i32, i32) {
    %c0_i32 = arith.constant 0 : i32
    %c0_i32_0 = arith.constant 0 : i32
    return %arg0, %c0_i32 : i32, i32
  }
  func.func @transform_4(%arg0: i32, %arg1: i32) -> (i32, i32) {
    %c0_i32 = arith.constant 0 : i32
    %c0_i32_0 = arith.constant 0 : i32
    %c0_i32_1 = arith.constant 0 : i32
    return %c0_i32, %c0_i32_0 : i32, i32
  }
  func.func @transform_5(%arg0: i32, %arg1: i32) -> (i32, i32) {
    %c0_i32 = arith.constant 0 : i32
    %c0_i32_0 = arith.constant 0 : i32
    %c0_i32_1 = arith.constant 0 : i32
    return %c0_i32, %c0_i32_0 : i32, i32
  }
  func.func @transform_6(%arg0: i32, %arg1: i32) -> (i32, i32) {
    %c0_i32 = arith.constant 0 : i32
    %c0_i32_0 = arith.constant 0 : i32
    %c0_i32_1 = arith.constant 0 : i32
    return %c0_i32, %c0_i32_0 : i32, i32
  }
  func.func @transform_7(%arg0: i32, %arg1: i32) -> (i32, i32) {
    %c0_i32 = arith.constant 0 : i32
    %c0_i32_0 = arith.constant 0 : i32
    return %arg0, %c0_i32 : i32, i32
  }
}

</mosaic_0001>

<bundles_post_ra>
// kernel: sage_forward.3
= control target key start
LH: loop header
LB: loop body
LE: loop exit
PB: predicated region body
PF: predicated region fallthrough
CT: control target
= control target key end

     0   :  { %v1152_v1 = vmov 0   ;;  %s1418_s1 = inlined_call_operand.vmem [shape: bf16[128,128], index: 1, kind: input, shape index: {}, may-alias: {1,2}]   ;;  %s1419_s0 = inlined_call_operand.vmem [shape: bf16[128,128], index: 0, kind: input, shape index: {}]   ;;  %s1420_s3 = inlined_call_operand.vmem [shape: f32[128,1], index: 3, kind: input, shape index: {}]   ;;  %s1421_s5 = inlined_call_operand.vmem [shape: bf16[128,128], index: 5, kind: input, shape index: {}]   ;;  %s1422_s4 = inlined_call_operand.vmem [shape: bf16[128,128], index: 4, kind: input, shape index: {}]   ;;  %s1423_s2 = inlined_call_operand.vmem [shape: bf16[128,128], index: 2, kind: input, shape index: {}, may-alias: {1,2}]   ;;  %s1424_s6 = inlined_call_operand.vmem [shape: f32[1,128], index: 6, kind: input, shape index: {}]   ;;  %s1425_s7 = inlined_call_operand.vmem [shape: f32[128,128], index: 7, kind: output, shape index: {}]  }
   0x1   :  { %v1112_v0 = vld [vmem:[%s1418_s1] sm:$0xff]   ;;  %1111 = vset.pattern.permute.xlu1 %v1152_v1  ;;  %1110 = vset.pattern.permute.xlu0 %v1152_v1  ;;  %v1113_v2 = vld [vmem:[%s1418_s1 + $0x8] sm:$0xff]   ;;  %v1114_v3 = vld [vmem:[%s1418_s1 + $0x10] sm:$0xff]  }
   0x2   :  { %981 = vmatprep.subr.bf16.mxu0 %v1112_v0  ;;  %v1115_v4 = vld [vmem:[%s1418_s1 + $0x18] sm:$0xff]   ;;  %v1120_v5 = vld [vmem:[%s1419_s0] sm:$0xff]   ;;  %v1117_v7 = vld [vmem:[%s1418_s1 + $0x28] sm:$0xff]  }
   0x3   :  { %982 = vmatpush3.bf16.msra.mxu0 %v1112_v0  ;;  %997 = vmatprep.mubr.bf16.mxu0 %v1120_v5  ;;  %v1116_v6 = vld [vmem:[%s1418_s1 + $0x20] sm:$0xff]   ;;  %v345_v8 = vld [vmem:[%s1420_s3 + $0x10] sm:$0xff]  ;;  %v346_v10 = vld [vmem:[%s1420_s3 + $0x18] sm:$0xff] }
   0x4   :  { %983 = vmatprep.subr.bf16.mxu0 %v1113_v2  ;;  %v343_v9 = vld [vmem:[%s1420_s3] sm:$0xff]  ;;  %371 = vperm.xlu1 %1111, %v345_v8   ;;  %v344_v11 = vld [vmem:[%s1420_s3 + $0x8] sm:$0xff]  ;;  %v1118_v12 = vld [vmem:[%s1418_s1 + $0x30] sm:$0xff]  }
   0x5   :  { %361 = vperm.xlu0 %1110, %v343_v9   ;;  %v352_v13 = vld [vmem:[%s1420_s3 + $0x48] sm:$0xff]  ;;  %v351_v14 = vld [vmem:[%s1420_s3 + $0x40] sm:$0xff]  ;;  %v1119_v17 = vld [vmem:[%s1418_s1 + $0x38] sm:$0xff]  }
   0x6   :  { %v1128_v15 = vld [vmem:[%s1421_s5] sm:$0xff]   ;;  %v1129_v16 = vld [vmem:[%s1421_s5 + $0x8] sm:$0xff]   ;;  %v354_v18 = vld [vmem:[%s1420_s3 + $0x58] sm:$0xff] }
   0x7   :  { %984 = vmatpush3.bf16.msra.mxu0 %v1113_v2  ;;  %1013 = vmatprep.subr.bf16.mxu1 %v1128_v15  ;;  %v353_v19 = vld [vmem:[%s1420_s3 + $0x50] sm:$0xff]  ;;  %v1121_v21 = vld [vmem:[%s1419_s0 + $0x8] sm:$0xff]   ;;  %v1259_v22 = vld [vmem:[%s1422_s4] sm:$0xff]  }
   0x8   :  { %985 = vmatprep.subr.bf16.mxu0 %v1114_v3  ;;  %376 = vperm.xlu1 %1111, %v346_v10   ;;  %v1130_v20 = vld [vmem:[%s1421_s5 + $0x10] sm:$0xff]   ;;  %v348_v24 = vld [vmem:[%s1420_s3 + $0x28] sm:$0xff]  ;;  %v347_v25 = vld [vmem:[%s1420_s3 + $0x20] sm:$0xff] }
   0x9   :  { %366 = vperm.xlu0 %1110, %v344_v11   ;;  %1014 = vmatpush3.bf16.msra.mxu1 %v1128_v15  ;;  %v1122_v23 = vld [vmem:[%s1419_s0 + $0x10] sm:$0xff]   ;;  %v1131_v26 = vld [vmem:[%s1421_s5 + $0x18] sm:$0xff]   ;;  %v1139_v29 = vld [vmem:[%s1423_s2] sm:$0xff]  }
   0xa   :  { %1015 = vmatprep.subr.bf16.mxu1 %v1129_v16  ;;  %v350_v27 = vld [vmem:[%s1420_s3 + $0x38] sm:$0xff]  ;;  %v349_v28 = vld [vmem:[%s1420_s3 + $0x30] sm:$0xff]  ;;  %v1135_v30 = vld [vmem:[%s1422_s4 + $0x8] sm:$0xff]   ;;  %1029 = vmatprep.mubr.bf16.mxu1 %v1139_v29 }
   0xb   :  { %986 = vmatpush3.bf16.msra.mxu0 %v1114_v3  ;;  %v1132_v31 = vld [vmem:[%s1421_s5 + $0x20] sm:$0xff]   ;;  %v1123_v32 = vld [vmem:[%s1419_s0 + $0x18] sm:$0xff]   ;;  %v356_v33 = vld [vmem:[%s1420_s3 + $0x68] sm:$0xff] }
   0xc   :  { %987 = vmatprep.subr.bf16.mxu0 %v1115_v4  ;;  %406 = vperm.xlu1 %1111, %v352_v13   ;;  %v355_v34 = vld [vmem:[%s1420_s3 + $0x60] sm:$0xff]  ;;  %v1134_v36 = vld [vmem:[%s1421_s5 + $0x28] sm:$0xff]   ;;  %v358_v37 = vld [vmem:[%s1420_s3 + $0x78] sm:$0xff] }
   0xd   :  { %401 = vperm.xlu0 %1110, %v351_v14   ;;  %1016 = vmatpush3.bf16.msra.mxu1 %v1129_v16  ;;  %v1124_v35 = vld [vmem:[%s1419_s0 + $0x20] sm:$0xff]   ;;  %v357_v38 = vld [vmem:[%s1420_s3 + $0x70] sm:$0xff]  ;;  %v1140_v41 = vld [vmem:[%s1422_s4 + $0x18] sm:$0xff]  }
   0xe   :  { %1017 = vmatprep.subr.bf16.mxu1 %v1130_v20  ;;  %v1137_v39 = vld [vmem:[%s1422_s4 + $0x10] sm:$0xff]   ;;  %v1125_v42 = vld [vmem:[%s1419_s0 + $0x28] sm:$0xff]   ;;  %v1138_v44 = vld [vmem:[%s1421_s5 + $0x38] sm:$0xff]  }
   0xf   :  { %988 = vmatpush3.bf16.msra.mxu0 %v1115_v4  ;;  %v1136_v40 = vld [vmem:[%s1421_s5 + $0x30] sm:$0xff]   ;;  %v1142_v45 = vld [vmem:[%s1422_s4 + $0x20] sm:$0xff]   ;;  %v1141_v46 = vld [vmem:[%s1423_s2 + $0x8] sm:$0xff]  }
  0x10   :  { %989 = vmatprep.subr.bf16.mxu0 %v1116_v6  ;;  %416 = vperm.xlu1 %1111, %v354_v18   ;;  %v1126_v43 = vld [vmem:[%s1419_s0 + $0x30] sm:$0xff]   ;;  %v1144_v47 = vld [vmem:[%s1422_s4 + $0x28] sm:$0xff]   ;;  %v1127_v48 = vld [vmem:[%s1419_s0 + $0x38] sm:$0xff]  }
  0x11   :  { %411 = vperm.xlu0 %1110, %v353_v19   ;;  %1018 = vmatpush3.bf16.msra.mxu1 %v1130_v20  ;;  %v1143_v49 = vld [vmem:[%s1423_s2 + $0x10] sm:$0xff]   ;;  %v1145_v50 = vld [vmem:[%s1423_s2 + $0x18] sm:$0xff]   ;;  %v1148_v53 = vld [vmem:[%s1423_s2 + $0x20] sm:$0xff]  }
  0x12   :  { %1019 = vmatprep.subr.bf16.mxu1 %v1131_v26  ;;  %v1146_v51 = vld [vmem:[%s1422_s4 + $0x30] sm:$0xff]   ;;  %v1147_v52 = vld [vmem:[%s1422_s4 + $0x38] sm:$0xff]   ;;  %v1149_v54 = vld [vmem:[%s1423_s2 + $0x28] sm:$0xff]  }
  0x13   :  { %990 = vmatpush3.bf16.msra.mxu0 %v1116_v6  ;;  %v1150_v55 = vld [vmem:[%s1423_s2 + $0x30] sm:$0xff]   ;;  %v1151_v56 = vld [vmem:[%s1423_s2 + $0x38] sm:$0xff]  }
  0x14   :  { %991 = vmatprep.subr.bf16.mxu0 %v1117_v7  ;;  %386 = vperm.xlu1 %1111, %v348_v24  }
  0x15   :  { %381 = vperm.xlu0 %1110, %v347_v25   ;;  %1020 = vmatpush3.bf16.msra.mxu1 %v1131_v26 }
  0x16   :  { %1021 = vmatprep.subr.bf16.mxu1 %v1132_v31 }
  0x17   :  { %992 = vmatpush3.bf16.msra.mxu0 %v1117_v7 }
  0x18   :  { %993 = vmatprep.subr.bf16.mxu0 %v1118_v12  ;;  %396 = vperm.xlu1 %1111, %v350_v27  }
  0x19   :  { %391 = vperm.xlu0 %1110, %v349_v28   ;;  %1022 = vmatpush3.bf16.msra.mxu1 %v1132_v31 }
  0x1a   :  { %1023 = vmatprep.subr.bf16.mxu1 %v1134_v36 }
  0x1b   :  { %994 = vmatpush3.bf16.msra.mxu0 %v1118_v12 }
  0x1c   :  { %995 = vmatprep.subr.bf16.mxu0 %v1119_v17  ;;  %426 = vperm.xlu1 %1111, %v356_v33  }
  0x1d   :  { %421 = vperm.xlu0 %1110, %v355_v34   ;;  %1024 = vmatpush3.bf16.msra.mxu1 %v1134_v36 }
  0x1e   :  { %1025 = vmatprep.subr.bf16.mxu1 %v1136_v40 }
  0x1f   :  { %996 = vmatpush3.bf16.msra.mxu0 %v1119_v17 }
  0x20   :  { %1045 = vmatprep.subr.bf16.mxu0 %v1259_v22  ;;  %436 = vperm.xlu1 %1111, %v358_v37  }
  0x21   :  { %431 = vperm.xlu0 %1110, %v357_v38   ;;  %1026 = vmatpush3.bf16.msra.mxu1 %v1136_v40 }
  0x22   :  { %998 = vmatmul.mubr.bf16.vlgmr.msra.gmra.mrb[0].mxu0 %v1121_v21  ;;  %1027 = vmatprep.subr.bf16.mxu1 %v1138_v44 }
  0x23   :  { %1001 = vmatprep.mubr.bf16.mxu0 %v1122_v23  ;;  %1046 = vmatpush3.bf16.msra.mxu0 %v1259_v22 }
  0x24   :  { %1047 = vmatprep.subr.bf16.mxu0 %v1135_v30 }
  0x25   :  { %1028 = vmatpush3.bf16.msra.mxu1 %v1138_v44 }
  0x26   :  { %1077 = vmatprep.subr.bf16.mxu1 %v1259_v22 }
  0x27   :  { %1048 = vmatpush3.bf16.msra.mxu0 %v1135_v30 }
  0x28   :  { %1049 = vmatprep.subr.bf16.mxu0 %v1137_v39  ;;  %1030 = vmatmul.mubr.bf16.vlgmr.msra.gmra.mrb[0].mxu1 %v1141_v46 }
  0x29   :  { %1085 = vmatpush3.bf16.msra.mxu1 %v1259_v22  ;;  %1033 = vmatprep.mubr.bf16.mxu1 %v1143_v49 }
  0x2a   :  { %1002 = vmatmul.mubr.bf16.gmra.mrb[4].mxu0 %v1123_v32  ;;  %1078 = vmatprep.subr.bf16.mxu1 %v1135_v30 }
  0x2b   :  { %1005 = vmatprep.mubr.bf16.mxu0 %v1124_v35  ;;  %1050 = vmatpush3.bf16.msra.mxu0 %v1137_v39 }
  0x2c   :  { %1051 = vmatprep.subr.bf16.mxu0 %v1140_v41 }
  0x2d   :  { %1086 = vmatpush3.bf16.msra.mxu1 %v1135_v30 }
  0x2e   :  { %1079 = vmatprep.subr.bf16.mxu1 %v1137_v39 }
  0x2f   :  { %1052 = vmatpush3.bf16.msra.mxu0 %v1140_v41 }
  0x30   :  { %1053 = vmatprep.subr.bf16.mxu0 %v1142_v45  ;;  %1034 = vmatmul.mubr.bf16.gmra.mrb[4].mxu1 %v1145_v50 }
  0x31   :  { %1087 = vmatpush3.bf16.msra.mxu1 %v1137_v39  ;;  %1037 = vmatprep.mubr.bf16.mxu1 %v1148_v53 }
  0x32   :  { %1006 = vmatmul.mubr.bf16.gmra.mrb[8].mxu0 %v1125_v42  ;;  %1080 = vmatprep.subr.bf16.mxu1 %v1140_v41 }
  0x33   :  { %1009 = vmatprep.mubr.bf16.mxu0 %v1126_v43  ;;  %1054 = vmatpush3.bf16.msra.mxu0 %v1142_v45 }
  0x34   :  { %1055 = vmatprep.subr.bf16.mxu0 %v1144_v47 }
  0x35   :  { %1088 = vmatpush3.bf16.msra.mxu1 %v1140_v41 }
  0x36   :  { %1081 = vmatprep.subr.bf16.mxu1 %v1142_v45 }
  0x37   :  { %1056 = vmatpush3.bf16.msra.mxu0 %v1144_v47 }
  0x38   :  { %1057 = vmatprep.subr.bf16.mxu0 %v1146_v51  ;;  %1038 = vmatmul.mubr.bf16.gmra.mrb[8].mxu1 %v1149_v54 }
  0x39   :  { %1089 = vmatpush3.bf16.msra.mxu1 %v1142_v45  ;;  %1041 = vmatprep.mubr.bf16.mxu1 %v1150_v55 }
  0x3a   :  { %1010 = vmatmul.mubr.bf16.gmra.mrb[12].mxu0 %v1127_v48  ;;  %1082 = vmatprep.subr.bf16.mxu1 %v1144_v47 }
  0x3b   :  { %1058 = vmatpush3.bf16.msra.mxu0 %v1146_v51 }
  0x3c   :  { %1059 = vmatprep.subr.bf16.mxu0 %v1147_v52 }
  0x3d   :  { %1090 = vmatpush3.bf16.msra.mxu1 %v1144_v47 }
  0x3e   :  { %1083 = vmatprep.subr.bf16.mxu1 %v1146_v51 }
  0x3f   :  { %1060 = vmatpush3.bf16.msra.mxu0 %v1147_v52 }
  0x40   :  { %1042 = vmatmul.mubr.bf16.gmra.mrb[12].mxu1 %v1151_v56 }
  0x41   :  { %1091 = vmatpush3.bf16.msra.mxu1 %v1146_v51 }
  0x42   :  { %1084 = vmatprep.subr.bf16.mxu1 %v1147_v52 }
  0x45   :  { %1092 = vmatpush3.bf16.msra.mxu1 %v1147_v52 }
  0x83   :  { %v372_v57 = vpop.permute.xlu1 %371 }
  0x84   :  { %v362_v58 = vpop.permute.xlu0 %361 }
  0x87   :  { %v377_v59 = vpop.permute.xlu1 %376 }
  0x88   :  { %v367_v60 = vpop.permute.xlu0 %366 }
  0x8b   :  { %v407_v61 = vpop.permute.xlu1 %406 }
  0x8c   :  { %v402_v62 = vpop.permute.xlu0 %401 }
  0x8f   :  { %v417_v63 = vpop.permute.xlu1 %416 }
  0x90   :  { %v412_v0 = vpop.permute.xlu0 %411 }
  0x93   :  { %v387_v4 = vpop.permute.xlu1 %386 }
  0x94   :  { %v382_v8 = vpop.permute.xlu0 %381 }
  0x97   :  { %v397_v14 = vpop.permute.xlu1 %396 }
  0x98   :  { %v392_v16 = vpop.permute.xlu0 %391 }
  0x9b   :  { %v427_v25 = vpop.permute.xlu1 %426 }
  0x9c   :  { %v422_v27 = vpop.permute.xlu0 %421 }
  0x9f   :  { %v437_v36 = vpop.permute.xlu1 %436 }
  0xa0   :  { %v432_v38 = vpop.permute.xlu0 %431 }
  0xf5   :  { %v999_v1 = vpop.f32.mrb[0].mxu0 }
  0xf6   :  { %v189_v2 = vpop.f32.mrb[1].mxu0  ;;  %v441_v5 = vmul.f32 %v999_v1, %v372_v57 }
  0xf7   :  { %v1000_v3 = vpop.f32.mrb[2].mxu0  ;;  %v439_v9 = vmul.f32 %v362_v58, %v189_v2  ;;  %v932_v58 = vld [vmem:[%s1424_s6] ss:$0 sm:$0xff] }
  0xf8   :  { %v442_v6 = vmul.f32 %v1000_v3, %v377_v59  ;;  %v192_v7 = vpop.f32.mrb[3].mxu0 }
  0xf9   :  { %v440_v10 = vmul.f32 %v367_v60, %v192_v7 }
  0xfa   :  { %v456_v11 = vpack.c.bf16 %v442_v6, %v441_v5 }
  0xfb   :  { %v455_v12 = vpack.c.bf16 %v440_v10, %v439_v9  ;;  %v1031_v39 = vpop.f32.mrb[0].mxu1 }
  0xfc   :  { %v641_v41 = vpop.f32.mrb[1].mxu1 }
  0xfd   :  { %v1003_v13 = vpop.f32.mrb[4].mxu0  ;;  %1061 = vmatprep.mubr.bf16.mxu0 %v455_v12  ;;  %v1032_v43 = vpop.f32.mrb[2].mxu1 }
  0xfe   :  { %v205_v15 = vpop.f32.mrb[5].mxu0  ;;  %1062 = vmatmul.mubr.bf16.vlgmr.msra.gmra.mrb[16].mxu0 %v456_v11  ;;  %v445_v18 = vmul.f32 %v1003_v13, %v392_v16  ;;  %v644_v45 = vpop.f32.mrb[3].mxu1 }
  0xff   :  { %v1004_v17 = vpop.f32.mrb[6].mxu0  ;;  %v443_v21 = vmul.f32 %v382_v8, %v205_v15 }
 0x100   :  { %v446_v19 = vmul.f32 %v1004_v17, %v397_v14  ;;  %v208_v20 = vpop.f32.mrb[7].mxu0 }
 0x101   :  { %v444_v22 = vmul.f32 %v387_v4, %v208_v20 }
 0x102   :  { %v458_v23 = vpack.c.bf16 %v446_v19, %v445_v18 }
 0x103   :  { %v457_v24 = vpack.c.bf16 %v444_v22, %v443_v21  ;;  %v1035_v53 = vpop.f32.mrb[4].mxu1 }
 0x104   :  { %v657_v54 = vpop.f32.mrb[5].mxu1 }
 0x105   :  { %v1007_v26 = vpop.f32.mrb[8].mxu0  ;;  %1065 = vmatprep.mubr.bf16.mxu0 %v457_v24  ;;  %v1036_v55 = vpop.f32.mrb[6].mxu1 }
 0x106   :  { %v221_v28 = vpop.f32.mrb[9].mxu0  ;;  %1066 = vmatmul.mubr.bf16.gmra.mrb[20].mxu0 %v458_v23  ;;  %v449_v30 = vmul.f32 %v1007_v26, %v412_v0  ;;  %v660_v56 = vpop.f32.mrb[7].mxu1 }
 0x107   :  { %v1008_v29 = vpop.f32.mrb[10].mxu0  ;;  %v447_v33 = vmul.f32 %v402_v62, %v221_v28 }
 0x108   :  { %v450_v31 = vmul.f32 %v1008_v29, %v417_v63  ;;  %v224_v32 = vpop.f32.mrb[11].mxu0 }
 0x109   :  { %v448_v34 = vmul.f32 %v407_v61, %v224_v32 }
 0x10a   :  { %v460_v35 = vpack.c.bf16 %v450_v31, %v449_v30 }
 0x10b   :  { %v459_v37 = vpack.c.bf16 %v448_v34, %v447_v33 }
 0x10d   :  { %v1011_v40 = vpop.f32.mrb[12].mxu0  ;;  %1069 = vmatprep.mubr.bf16.mxu1 %v459_v37 }
 0x10e   :  { %v237_v42 = vpop.f32.mrb[13].mxu0  ;;  %1070 = vmatmul.mubr.bf16.vlgmr.msra.gmra.mrb[8].mxu1 %v460_v35  ;;  %v453_v46 = vmul.f32 %v1011_v40, %v432_v38 }
 0x10f   :  { %v1012_v44 = vpop.f32.mrb[14].mxu0  ;;  %v451_v49 = vmul.f32 %v422_v27, %v237_v42 }
 0x110   :  { %v454_v47 = vmul.f32 %v1012_v44, %v437_v36  ;;  %v240_v48 = vpop.f32.mrb[15].mxu0 }
 0x111   :  { %v452_v50 = vmul.f32 %v427_v25, %v240_v48 }
 0x112   :  { %v462_v51 = vpack.c.bf16 %v454_v47, %v453_v46 }
 0x113   :  { %v461_v52 = vpack.c.bf16 %v452_v50, %v451_v49 }
 0x115   :  { %1073 = vmatprep.mubr.bf16.mxu1 %v461_v52 }
 0x116   :  { %1074 = vmatmul.mubr.bf16.gmra.mrb[12].mxu1 %v462_v51 }
 0x1d1   :  { %v1063_v57 = vpop.f32.mrb[16].mxu0 }
 0x1d2   :  { %v795_v59 = vadd.f32 %v1063_v57, %v1031_v39  ;;  %v786_v60 = vpop.f32.mrb[17].mxu0 }
 0x1d3   :  { %v787_v61 = vadd.f32 %v786_v60, %v641_v41  ;;  %v1064_v62 = vpop.f32.mrb[18].mxu0 }
 0x1d4   :  { %v858_v63 = vadd.f32 %v932_v58, %v795_v59  ;;  %v798_v0 = vadd.f32 %v1064_v62, %v1032_v43  ;;  %v789_v1 = vpop.f32.mrb[19].mxu0 }
 0x1d5   :  { %v856_v2 = vadd.f32 %v932_v58, %v787_v61  ;;  %v790_v3 = vadd.f32 %v789_v1, %v644_v45 }
 0x1d6   :  { %874 = vst [vmem:[%s1425_s7 + $0x10] sm:$0xff] %v858_v63  ;;  %v859_v4 = vadd.f32 %v932_v58, %v798_v0 }
 0x1d7   :  { %872 = vst [vmem:[%s1425_s7] sm:$0xff] %v856_v2  ;;  %v857_v5 = vadd.f32 %v932_v58, %v790_v3 }
 0x1d8   :  { %875 = vst [vmem:[%s1425_s7 + $0x18] sm:$0xff] %v859_v4 }
 0x1d9   :  { %873 = vst [vmem:[%s1425_s7 + $0x8] sm:$0xff] %v857_v5  ;;  %v1067_v6 = vpop.f32.mrb[20].mxu0 }
 0x1da   :  { %v811_v7 = vadd.f32 %v1067_v6, %v1035_v53  ;;  %v802_v8 = vpop.f32.mrb[21].mxu0 }
 0x1db   :  { %v803_v9 = vadd.f32 %v802_v8, %v657_v54  ;;  %v1068_v10 = vpop.f32.mrb[22].mxu0 }
 0x1dc   :  { %v862_v11 = vadd.f32 %v932_v58, %v811_v7  ;;  %v814_v12 = vadd.f32 %v1068_v10, %v1036_v55  ;;  %v805_v13 = vpop.f32.mrb[23].mxu0 }
 0x1dd   :  { %v860_v14 = vadd.f32 %v932_v58, %v803_v9  ;;  %v806_v15 = vadd.f32 %v805_v13, %v660_v56 }
 0x1de   :  { %878 = vst [vmem:[%s1425_s7 + $0x30] sm:$0xff] %v862_v11  ;;  %v863_v16 = vadd.f32 %v932_v58, %v814_v12 }
 0x1df   :  { %876 = vst [vmem:[%s1425_s7 + $0x20] sm:$0xff] %v860_v14  ;;  %v861_v17 = vadd.f32 %v932_v58, %v806_v15 }
 0x1e0   :  { %879 = vst [vmem:[%s1425_s7 + $0x38] sm:$0xff] %v863_v16 }
 0x1e1   :  { %877 = vst [vmem:[%s1425_s7 + $0x28] sm:$0xff] %v861_v17  ;;  %v1071_v18 = vpop.f32.mrb[8].mxu1 }
 0x1e2   :  { %v866_v19 = vadd.f32 %v1071_v18, %v932_v58  ;;  %v818_v20 = vpop.f32.mrb[9].mxu1 }
 0x1e3   :  { %v864_v21 = vadd.f32 %v932_v58, %v818_v20  ;;  %v1072_v22 = vpop.f32.mrb[10].mxu1 }
 0x1e4   :  { %882 = vst [vmem:[%s1425_s7 + $0x50] sm:$0xff] %v866_v19  ;;  %v867_v23 = vadd.f32 %v1072_v22, %v932_v58  ;;  %v821_v24 = vpop.f32.mrb[11].mxu1 }
 0x1e5   :  { %880 = vst [vmem:[%s1425_s7 + $0x40] sm:$0xff] %v864_v21  ;;  %v865_v25 = vadd.f32 %v932_v58, %v821_v24 }
 0x1e6   :  { %883 = vst [vmem:[%s1425_s7 + $0x58] sm:$0xff] %v867_v23 }
 0x1e7   :  { %881 = vst [vmem:[%s1425_s7 + $0x48] sm:$0xff] %v865_v25 }
 0x1e9   :  { %v1075_v26 = vpop.f32.mrb[12].mxu1 }
 0x1ea   :  { %v870_v27 = vadd.f32 %v1075_v26, %v932_v58  ;;  %v834_v28 = vpop.f32.mrb[13].mxu1 }
 0x1eb   :  { %v868_v29 = vadd.f32 %v932_v58, %v834_v28  ;;  %v1076_v30 = vpop.f32.mrb[14].mxu1 }
 0x1ec   :  { %886 = vst [vmem:[%s1425_s7 + $0x70] sm:$0xff] %v870_v27  ;;  %v871_v31 = vadd.f32 %v1076_v30, %v932_v58  ;;  %v837_v32 = vpop.f32.mrb[15].mxu1 }
 0x1ed   :  { %884 = vst [vmem:[%s1425_s7 + $0x60] sm:$0xff] %v868_v29  ;;  %v869_v33 = vadd.f32 %v932_v58, %v837_v32 }
 0x1ee   :  { %887 = vst [vmem:[%s1425_s7 + $0x78] sm:$0xff] %v871_v31 }
 0x1ef   :  { %885 = vst [vmem:[%s1425_s7 + $0x68] sm:$0xff] %v869_v33 }

// kernel: sage_forward.2
= control target key start
LH: loop header
LB: loop body
LE: loop exit
PB: predicated region body
PF: predicated region fallthrough
CT: control target
= control target key end

     0   :  { %v1311_v1 = vmov 0   ;;  %s1571_s1 = inlined_call_operand.vmem [shape: bf16[128,128], index: 1, kind: input, shape index: {}, may-alias: {1,2}]   ;;  %s1572_s0 = inlined_call_operand.vmem [shape: bf16[128,128], index: 0, kind: input, shape index: {}]   ;;  %s1573_s3 = inlined_call_operand.vmem [shape: f32[128,1], index: 3, kind: input, shape index: {}]   ;;  %s1574_s5 = inlined_call_operand.vmem [shape: bf16[128,128], index: 5, kind: input, shape index: {}]   ;;  %s1575_s4 = inlined_call_operand.vmem [shape: bf16[128,128], index: 4, kind: input, shape index: {}]   ;;  %s1576_s2 = inlined_call_operand.vmem [shape: bf16[128,128], index: 2, kind: input, shape index: {}, may-alias: {1,2}]   ;;  %s1577_s6 = inlined_call_operand.vmem [shape: f32[1,128], index: 6, kind: input, shape index: {}]   ;;  %s1578_s7 = inlined_call_operand.vmem [shape: bf16[128,128], index: 7, kind: output, shape index: {}]  }
   0x1   :  { %v1271_v0 = vld [vmem:[%s1571_s1] sm:$0xff]   ;;  %1270 = vset.pattern.permute.xlu1 %v1311_v1  ;;  %1269 = vset.pattern.permute.xlu0 %v1311_v1  ;;  %v1272_v2 = vld [vmem:[%s1571_s1 + $0x8] sm:$0xff]   ;;  %v1273_v3 = vld [vmem:[%s1571_s1 + $0x10] sm:$0xff]  }
   0x2   :  { %1140 = vmatprep.subr.bf16.mxu0 %v1271_v0  ;;  %v1274_v4 = vld [vmem:[%s1571_s1 + $0x18] sm:$0xff]   ;;  %v1279_v5 = vld [vmem:[%s1572_s0] sm:$0xff]   ;;  %v1276_v7 = vld [vmem:[%s1571_s1 + $0x28] sm:$0xff]  }
   0x3   :  { %1141 = vmatpush3.bf16.msra.mxu0 %v1271_v0  ;;  %1156 = vmatprep.mubr.bf16.mxu0 %v1279_v5  ;;  %v1275_v6 = vld [vmem:[%s1571_s1 + $0x20] sm:$0xff]   ;;  %v345_v8 = vld [vmem:[%s1573_s3 + $0x10] sm:$0xff]  ;;  %v346_v10 = vld [vmem:[%s1573_s3 + $0x18] sm:$0xff] }
   0x4   :  { %1142 = vmatprep.subr.bf16.mxu0 %v1272_v2  ;;  %v343_v9 = vld [vmem:[%s1573_s3] sm:$0xff]  ;;  %371 = vperm.xlu1 %1270, %v345_v8   ;;  %v344_v11 = vld [vmem:[%s1573_s3 + $0x8] sm:$0xff]  ;;  %v1277_v12 = vld [vmem:[%s1571_s1 + $0x30] sm:$0xff]  }
   0x5   :  { %361 = vperm.xlu0 %1269, %v343_v9   ;;  %v352_v13 = vld [vmem:[%s1573_s3 + $0x48] sm:$0xff]  ;;  %v351_v14 = vld [vmem:[%s1573_s3 + $0x40] sm:$0xff]  ;;  %v1278_v17 = vld [vmem:[%s1571_s1 + $0x38] sm:$0xff]  }
   0x6   :  { %v1287_v15 = vld [vmem:[%s1574_s5] sm:$0xff]   ;;  %v1288_v16 = vld [vmem:[%s1574_s5 + $0x8] sm:$0xff]   ;;  %v354_v18 = vld [vmem:[%s1573_s3 + $0x58] sm:$0xff] }
   0x7   :  { %1143 = vmatpush3.bf16.msra.mxu0 %v1272_v2  ;;  %1172 = vmatprep.subr.bf16.mxu1 %v1287_v15  ;;  %v353_v19 = vld [vmem:[%s1573_s3 + $0x50] sm:$0xff]  ;;  %v1280_v21 = vld [vmem:[%s1572_s0 + $0x8] sm:$0xff]   ;;  %v1418_v22 = vld [vmem:[%s1575_s4] sm:$0xff]  }
   0x8   :  { %1144 = vmatprep.subr.bf16.mxu0 %v1273_v3  ;;  %376 = vperm.xlu1 %1270, %v346_v10   ;;  %v1289_v20 = vld [vmem:[%s1574_s5 + $0x10] sm:$0xff]   ;;  %v348_v24 = vld [vmem:[%s1573_s3 + $0x28] sm:$0xff]  ;;  %v347_v25 = vld [vmem:[%s1573_s3 + $0x20] sm:$0xff] }
   0x9   :  { %366 = vperm.xlu0 %1269, %v344_v11   ;;  %1173 = vmatpush3.bf16.msra.mxu1 %v1287_v15  ;;  %v1281_v23 = vld [vmem:[%s1572_s0 + $0x10] sm:$0xff]   ;;  %v1290_v26 = vld [vmem:[%s1574_s5 + $0x18] sm:$0xff]   ;;  %v1298_v29 = vld [vmem:[%s1576_s2] sm:$0xff]  }
   0xa   :  { %1174 = vmatprep.subr.bf16.mxu1 %v1288_v16  ;;  %v350_v27 = vld [vmem:[%s1573_s3 + $0x38] sm:$0xff]  ;;  %v349_v28 = vld [vmem:[%s1573_s3 + $0x30] sm:$0xff]  ;;  %v1294_v30 = vld [vmem:[%s1575_s4 + $0x8] sm:$0xff]   ;;  %1188 = vmatprep.mubr.bf16.mxu1 %v1298_v29 }
   0xb   :  { %1145 = vmatpush3.bf16.msra.mxu0 %v1273_v3  ;;  %v1291_v31 = vld [vmem:[%s1574_s5 + $0x20] sm:$0xff]   ;;  %v1282_v32 = vld [vmem:[%s1572_s0 + $0x18] sm:$0xff]   ;;  %v356_v33 = vld [vmem:[%s1573_s3 + $0x68] sm:$0xff] }
   0xc   :  { %1146 = vmatprep.subr.bf16.mxu0 %v1274_v4  ;;  %406 = vperm.xlu1 %1270, %v352_v13   ;;  %v355_v34 = vld [vmem:[%s1573_s3 + $0x60] sm:$0xff]  ;;  %v1293_v36 = vld [vmem:[%s1574_s5 + $0x28] sm:$0xff]   ;;  %v358_v37 = vld [vmem:[%s1573_s3 + $0x78] sm:$0xff] }
   0xd   :  { %401 = vperm.xlu0 %1269, %v351_v14   ;;  %1175 = vmatpush3.bf16.msra.mxu1 %v1288_v16  ;;  %v1283_v35 = vld [vmem:[%s1572_s0 + $0x20] sm:$0xff]   ;;  %v357_v38 = vld [vmem:[%s1573_s3 + $0x70] sm:$0xff]  ;;  %v1299_v41 = vld [vmem:[%s1575_s4 + $0x18] sm:$0xff]  }
   0xe   :  { %1176 = vmatprep.subr.bf16.mxu1 %v1289_v20  ;;  %v1296_v39 = vld [vmem:[%s1575_s4 + $0x10] sm:$0xff]   ;;  %v1284_v42 = vld [vmem:[%s1572_s0 + $0x28] sm:$0xff]   ;;  %v1297_v44 = vld [vmem:[%s1574_s5 + $0x38] sm:$0xff]  }
   0xf   :  { %1147 = vmatpush3.bf16.msra.mxu0 %v1274_v4  ;;  %v1295_v40 = vld [vmem:[%s1574_s5 + $0x30] sm:$0xff]   ;;  %v1301_v45 = vld [vmem:[%s1575_s4 + $0x20] sm:$0xff]   ;;  %v1300_v46 = vld [vmem:[%s1576_s2 + $0x8] sm:$0xff]  }
  0x10   :  { %1148 = vmatprep.subr.bf16.mxu0 %v1275_v6  ;;  %416 = vperm.xlu1 %1270, %v354_v18   ;;  %v1285_v43 = vld [vmem:[%s1572_s0 + $0x30] sm:$0xff]   ;;  %v1303_v47 = vld [vmem:[%s1575_s4 + $0x28] sm:$0xff]   ;;  %v1286_v48 = vld [vmem:[%s1572_s0 + $0x38] sm:$0xff]  }
  0x11   :  { %411 = vperm.xlu0 %1269, %v353_v19   ;;  %1177 = vmatpush3.bf16.msra.mxu1 %v1289_v20  ;;  %v1302_v49 = vld [vmem:[%s1576_s2 + $0x10] sm:$0xff]   ;;  %v1304_v50 = vld [vmem:[%s1576_s2 + $0x18] sm:$0xff]   ;;  %v1307_v53 = vld [vmem:[%s1576_s2 + $0x20] sm:$0xff]  }
  0x12   :  { %1178 = vmatprep.subr.bf16.mxu1 %v1290_v26  ;;  %v1305_v51 = vld [vmem:[%s1575_s4 + $0x30] sm:$0xff]   ;;  %v1306_v52 = vld [vmem:[%s1575_s4 + $0x38] sm:$0xff]   ;;  %v1308_v54 = vld [vmem:[%s1576_s2 + $0x28] sm:$0xff]  }
  0x13   :  { %1149 = vmatpush3.bf16.msra.mxu0 %v1275_v6  ;;  %v1309_v55 = vld [vmem:[%s1576_s2 + $0x30] sm:$0xff]   ;;  %v1310_v56 = vld [vmem:[%s1576_s2 + $0x38] sm:$0xff]  }
  0x14   :  { %1150 = vmatprep.subr.bf16.mxu0 %v1276_v7  ;;  %386 = vperm.xlu1 %1270, %v348_v24  }
  0x15   :  { %381 = vperm.xlu0 %1269, %v347_v25   ;;  %1179 = vmatpush3.bf16.msra.mxu1 %v1290_v26 }
  0x16   :  { %1180 = vmatprep.subr.bf16.mxu1 %v1291_v31 }
  0x17   :  { %1151 = vmatpush3.bf16.msra.mxu0 %v1276_v7 }
  0x18   :  { %1152 = vmatprep.subr.bf16.mxu0 %v1277_v12  ;;  %396 = vperm.xlu1 %1270, %v350_v27  }
  0x19   :  { %391 = vperm.xlu0 %1269, %v349_v28   ;;  %1181 = vmatpush3.bf16.msra.mxu1 %v1291_v31 }
  0x1a   :  { %1182 = vmatprep.subr.bf16.mxu1 %v1293_v36 }
  0x1b   :  { %1153 = vmatpush3.bf16.msra.mxu0 %v1277_v12 }
  0x1c   :  { %1154 = vmatprep.subr.bf16.mxu0 %v1278_v17  ;;  %426 = vperm.xlu1 %1270, %v356_v33  }
  0x1d   :  { %421 = vperm.xlu0 %1269, %v355_v34   ;;  %1183 = vmatpush3.bf16.msra.mxu1 %v1293_v36 }
  0x1e   :  { %1184 = vmatprep.subr.bf16.mxu1 %v1295_v40 }
  0x1f   :  { %1155 = vmatpush3.bf16.msra.mxu0 %v1278_v17 }
  0x20   :  { %1204 = vmatprep.subr.bf16.mxu0 %v1418_v22  ;;  %436 = vperm.xlu1 %1270, %v358_v37  }
  0x21   :  { %431 = vperm.xlu0 %1269, %v357_v38   ;;  %1185 = vmatpush3.bf16.msra.mxu1 %v1295_v40 }
  0x22   :  { %1157 = vmatmul.mubr.bf16.vlgmr.msra.gmra.mrb[0].mxu0 %v1280_v21  ;;  %1186 = vmatprep.subr.bf16.mxu1 %v1297_v44 }
  0x23   :  { %1160 = vmatprep.mubr.bf16.mxu0 %v1281_v23  ;;  %1205 = vmatpush3.bf16.msra.mxu0 %v1418_v22 }
  0x24   :  { %1206 = vmatprep.subr.bf16.mxu0 %v1294_v30 }
  0x25   :  { %1187 = vmatpush3.bf16.msra.mxu1 %v1297_v44 }
  0x26   :  { %1236 = vmatprep.subr.bf16.mxu1 %v1418_v22 }
  0x27   :  { %1207 = vmatpush3.bf16.msra.mxu0 %v1294_v30 }
  0x28   :  { %1208 = vmatprep.subr.bf16.mxu0 %v1296_v39  ;;  %1189 = vmatmul.mubr.bf16.vlgmr.msra.gmra.mrb[0].mxu1 %v1300_v46 }
  0x29   :  { %1244 = vmatpush3.bf16.msra.mxu1 %v1418_v22  ;;  %1192 = vmatprep.mubr.bf16.mxu1 %v1302_v49 }
  0x2a   :  { %1161 = vmatmul.mubr.bf16.gmra.mrb[4].mxu0 %v1282_v32  ;;  %1237 = vmatprep.subr.bf16.mxu1 %v1294_v30 }
  0x2b   :  { %1164 = vmatprep.mubr.bf16.mxu0 %v1283_v35  ;;  %1209 = vmatpush3.bf16.msra.mxu0 %v1296_v39 }
  0x2c   :  { %1210 = vmatprep.subr.bf16.mxu0 %v1299_v41 }
  0x2d   :  { %1245 = vmatpush3.bf16.msra.mxu1 %v1294_v30 }
  0x2e   :  { %1238 = vmatprep.subr.bf16.mxu1 %v1296_v39 }
  0x2f   :  { %1211 = vmatpush3.bf16.msra.mxu0 %v1299_v41 }
  0x30   :  { %1212 = vmatprep.subr.bf16.mxu0 %v1301_v45  ;;  %1193 = vmatmul.mubr.bf16.gmra.mrb[4].mxu1 %v1304_v50 }
  0x31   :  { %1246 = vmatpush3.bf16.msra.mxu1 %v1296_v39  ;;  %1196 = vmatprep.mubr.bf16.mxu1 %v1307_v53 }
  0x32   :  { %1165 = vmatmul.mubr.bf16.gmra.mrb[8].mxu0 %v1284_v42  ;;  %1239 = vmatprep.subr.bf16.mxu1 %v1299_v41 }
  0x33   :  { %1168 = vmatprep.mubr.bf16.mxu0 %v1285_v43  ;;  %1213 = vmatpush3.bf16.msra.mxu0 %v1301_v45 }
  0x34   :  { %1214 = vmatprep.subr.bf16.mxu0 %v1303_v47 }
  0x35   :  { %1247 = vmatpush3.bf16.msra.mxu1 %v1299_v41 }
  0x36   :  { %1240 = vmatprep.subr.bf16.mxu1 %v1301_v45 }
  0x37   :  { %1215 = vmatpush3.bf16.msra.mxu0 %v1303_v47 }
  0x38   :  { %1216 = vmatprep.subr.bf16.mxu0 %v1305_v51  ;;  %1197 = vmatmul.mubr.bf16.gmra.mrb[8].mxu1 %v1308_v54 }
  0x39   :  { %1248 = vmatpush3.bf16.msra.mxu1 %v1301_v45  ;;  %1200 = vmatprep.mubr.bf16.mxu1 %v1309_v55 }
  0x3a   :  { %1169 = vmatmul.mubr.bf16.gmra.mrb[12].mxu0 %v1286_v48  ;;  %1241 = vmatprep.subr.bf16.mxu1 %v1303_v47 }
  0x3b   :  { %1217 = vmatpush3.bf16.msra.mxu0 %v1305_v51 }
  0x3c   :  { %1218 = vmatprep.subr.bf16.mxu0 %v1306_v52 }
  0x3d   :  { %1249 = vmatpush3.bf16.msra.mxu1 %v1303_v47 }
  0x3e   :  { %1242 = vmatprep.subr.bf16.mxu1 %v1305_v51 }
  0x3f   :  { %1219 = vmatpush3.bf16.msra.mxu0 %v1306_v52 }
  0x40   :  { %1201 = vmatmul.mubr.bf16.gmra.mrb[12].mxu1 %v1310_v56 }
  0x41   :  { %1250 = vmatpush3.bf16.msra.mxu1 %v1305_v51 }
  0x42   :  { %1243 = vmatprep.subr.bf16.mxu1 %v1306_v52 }
  0x45   :  { %1251 = vmatpush3.bf16.msra.mxu1 %v1306_v52 }
  0x83   :  { %v372_v57 = vpop.permute.xlu1 %371 }
  0x84   :  { %v362_v58 = vpop.permute.xlu0 %361 }
  0x87   :  { %v377_v59 = vpop.permute.xlu1 %376 }
  0x88   :  { %v367_v60 = vpop.permute.xlu0 %366 }
  0x8b   :  { %v407_v61 = vpop.permute.xlu1 %406 }
  0x8c   :  { %v402_v62 = vpop.permute.xlu0 %401 }
  0x8f   :  { %v417_v63 = vpop.permute.xlu1 %416 }
  0x90   :  { %v412_v0 = vpop.permute.xlu0 %411 }
  0x93   :  { %v387_v4 = vpop.permute.xlu1 %386 }
  0x94   :  { %v382_v8 = vpop.permute.xlu0 %381 }
  0x97   :  { %v397_v14 = vpop.permute.xlu1 %396 }
  0x98   :  { %v392_v16 = vpop.permute.xlu0 %391 }
  0x9b   :  { %v427_v25 = vpop.permute.xlu1 %426 }
  0x9c   :  { %v422_v27 = vpop.permute.xlu0 %421 }
  0x9f   :  { %v437_v36 = vpop.permute.xlu1 %436 }
  0xa0   :  { %v432_v38 = vpop.permute.xlu0 %431 }
  0xf5   :  { %v1158_v1 = vpop.f32.mrb[0].mxu0 }
  0xf6   :  { %v189_v2 = vpop.f32.mrb[1].mxu0  ;;  %v441_v5 = vmul.f32 %v1158_v1, %v372_v57 }
  0xf7   :  { %v1159_v3 = vpop.f32.mrb[2].mxu0  ;;  %v439_v9 = vmul.f32 %v362_v58, %v189_v2  ;;  %v1529_v58 = vld [vmem:[%s1577_s6] ss:$0 sm:$0xff] }
  0xf8   :  { %v442_v6 = vmul.f32 %v1159_v3, %v377_v59  ;;  %v192_v7 = vpop.f32.mrb[3].mxu0 }
  0xf9   :  { %v440_v10 = vmul.f32 %v367_v60, %v192_v7 }
  0xfa   :  { %v456_v11 = vpack.c.bf16 %v442_v6, %v441_v5 }
  0xfb   :  { %v455_v12 = vpack.c.bf16 %v440_v10, %v439_v9  ;;  %v1190_v39 = vpop.f32.mrb[0].mxu1 }
  0xfc   :  { %v641_v41 = vpop.f32.mrb[1].mxu1 }
  0xfd   :  { %v1162_v13 = vpop.f32.mrb[4].mxu0  ;;  %1220 = vmatprep.mubr.bf16.mxu0 %v455_v12  ;;  %v1191_v43 = vpop.f32.mrb[2].mxu1 }
  0xfe   :  { %v205_v15 = vpop.f32.mrb[5].mxu0  ;;  %1221 = vmatmul.mubr.bf16.vlgmr.msra.gmra.mrb[16].mxu0 %v456_v11  ;;  %v445_v18 = vmul.f32 %v1162_v13, %v392_v16  ;;  %v644_v45 = vpop.f32.mrb[3].mxu1 }
  0xff   :  { %v1163_v17 = vpop.f32.mrb[6].mxu0  ;;  %v443_v21 = vmul.f32 %v382_v8, %v205_v15 }
 0x100   :  { %v446_v19 = vmul.f32 %v1163_v17, %v397_v14  ;;  %v208_v20 = vpop.f32.mrb[7].mxu0 }
 0x101   :  { %v444_v22 = vmul.f32 %v387_v4, %v208_v20 }
 0x102   :  { %v458_v23 = vpack.c.bf16 %v446_v19, %v445_v18 }
 0x103   :  { %v457_v24 = vpack.c.bf16 %v444_v22, %v443_v21  ;;  %v1194_v53 = vpop.f32.mrb[4].mxu1 }
 0x104   :  { %v657_v54 = vpop.f32.mrb[5].mxu1 }
 0x105   :  { %v1166_v26 = vpop.f32.mrb[8].mxu0  ;;  %1224 = vmatprep.mubr.bf16.mxu0 %v457_v24  ;;  %v1195_v55 = vpop.f32.mrb[6].mxu1 }
 0x106   :  { %v221_v28 = vpop.f32.mrb[9].mxu0  ;;  %1225 = vmatmul.mubr.bf16.gmra.mrb[20].mxu0 %v458_v23  ;;  %v449_v30 = vmul.f32 %v1166_v26, %v412_v0  ;;  %v660_v56 = vpop.f32.mrb[7].mxu1 }
 0x107   :  { %v1167_v29 = vpop.f32.mrb[10].mxu0  ;;  %v447_v33 = vmul.f32 %v402_v62, %v221_v28 }
 0x108   :  { %v450_v31 = vmul.f32 %v1167_v29, %v417_v63  ;;  %v224_v32 = vpop.f32.mrb[11].mxu0 }
 0x109   :  { %v448_v34 = vmul.f32 %v407_v61, %v224_v32 }
 0x10a   :  { %v460_v35 = vpack.c.bf16 %v450_v31, %v449_v30 }
 0x10b   :  { %v459_v37 = vpack.c.bf16 %v448_v34, %v447_v33 }
 0x10d   :  { %v1170_v40 = vpop.f32.mrb[12].mxu0  ;;  %1228 = vmatprep.mubr.bf16.mxu1 %v459_v37 }
 0x10e   :  { %v237_v42 = vpop.f32.mrb[13].mxu0  ;;  %1229 = vmatmul.mubr.bf16.vlgmr.msra.gmra.mrb[8].mxu1 %v460_v35  ;;  %v453_v46 = vmul.f32 %v1170_v40, %v432_v38 }
 0x10f   :  { %v1171_v44 = vpop.f32.mrb[14].mxu0  ;;  %v451_v49 = vmul.f32 %v422_v27, %v237_v42 }
 0x110   :  { %v454_v47 = vmul.f32 %v1171_v44, %v437_v36  ;;  %v240_v48 = vpop.f32.mrb[15].mxu0 }
 0x111   :  { %v452_v50 = vmul.f32 %v427_v25, %v240_v48 }
 0x112   :  { %v462_v51 = vpack.c.bf16 %v454_v47, %v453_v46 }
 0x113   :  { %v461_v52 = vpack.c.bf16 %v452_v50, %v451_v49 }
 0x115   :  { %1232 = vmatprep.mubr.bf16.mxu1 %v461_v52 }
 0x116   :  { %1233 = vmatmul.mubr.bf16.gmra.mrb[12].mxu1 %v462_v51 }
 0x1d1   :  { %v1222_v57 = vpop.f32.mrb[16].mxu0 }
 0x1d2   :  { %v795_v59 = vadd.f32 %v1222_v57, %v1190_v39  ;;  %v786_v60 = vpop.f32.mrb[17].mxu0 }
 0x1d3   :  { %v787_v61 = vadd.f32 %v786_v60, %v641_v41  ;;  %v1223_v62 = vpop.f32.mrb[18].mxu0 }
 0x1d4   :  { %v858_v63 = vadd.f32 %v1529_v58, %v795_v59  ;;  %v798_v0 = vadd.f32 %v1223_v62, %v1191_v43  ;;  %v789_v1 = vpop.f32.mrb[19].mxu0 }
 0x1d5   :  { %v856_v2 = vadd.f32 %v1529_v58, %v787_v61  ;;  %v790_v3 = vadd.f32 %v789_v1, %v644_v45 }
 0x1d6   :  { %v859_v4 = vadd.f32 %v1529_v58, %v798_v0  ;;  %v874_v6 = vmax.f32 %v858_v63, 0.0 }
 0x1d7   :  { %v857_v5 = vadd.f32 %v1529_v58, %v790_v3  ;;  %v872_v8 = vmax.f32 %v856_v2, 0.0 }
 0x1d8   :  { %v875_v7 = vmax.f32 %v859_v4, 0.0 }
 0x1d9   :  { %v873_v9 = vmax.f32 %v857_v5, 0.0  ;;  %v1226_v10 = vpop.f32.mrb[20].mxu0 }
 0x1da   :  { %v1053_v11 = vpack.c.bf16 %v875_v7, %v874_v6  ;;  %v811_v12 = vadd.f32 %v1226_v10, %v1194_v53  ;;  %v802_v13 = vpop.f32.mrb[21].mxu0 }
 0x1db   :  { %v1048_v14 = vpack.c.bf16 %v873_v9, %v872_v8  ;;  %v803_v15 = vadd.f32 %v802_v13, %v657_v54  ;;  %v1227_v16 = vpop.f32.mrb[22].mxu0 }
 0x1dc   :  { %1085 = vst [vmem:[%s1578_s7 + $0x8] sm:$0xff] %v1053_v11   ;;  %v862_v17 = vadd.f32 %v1529_v58, %v811_v12  ;;  %v814_v18 = vadd.f32 %v1227_v16, %v1195_v55  ;;  %v805_v19 = vpop.f32.mrb[23].mxu0 }
 0x1dd   :  { %1049 = vst [vmem:[%s1578_s7] sm:$0xff] %v1048_v14   ;;  %v860_v20 = vadd.f32 %v1529_v58, %v803_v15  ;;  %v806_v21 = vadd.f32 %v805_v19, %v660_v56 }
 0x1de   :  { %v863_v22 = vadd.f32 %v1529_v58, %v814_v18  ;;  %v878_v24 = vmax.f32 %v862_v17, 0.0 }
 0x1df   :  { %v861_v23 = vadd.f32 %v1529_v58, %v806_v21  ;;  %v876_v26 = vmax.f32 %v860_v20, 0.0 }
 0x1e0   :  { %v879_v25 = vmax.f32 %v863_v22, 0.0 }
 0x1e1   :  { %v877_v27 = vmax.f32 %v861_v23, 0.0  ;;  %v1230_v28 = vpop.f32.mrb[8].mxu1 }
 0x1e2   :  { %v1063_v29 = vpack.c.bf16 %v879_v25, %v878_v24  ;;  %v866_v30 = vadd.f32 %v1230_v28, %v1529_v58  ;;  %v818_v31 = vpop.f32.mrb[9].mxu1 }
 0x1e3   :  { %v1058_v32 = vpack.c.bf16 %v877_v27, %v876_v26  ;;  %v864_v33 = vadd.f32 %v1529_v58, %v818_v31  ;;  %v1231_v34 = vpop.f32.mrb[10].mxu1 }
 0x1e4   :  { %1087 = vst [vmem:[%s1578_s7 + $0x18] sm:$0xff] %v1063_v29   ;;  %v867_v35 = vadd.f32 %v1231_v34, %v1529_v58  ;;  %v821_v36 = vpop.f32.mrb[11].mxu1  ;;  %v882_v38 = vmax.f32 %v866_v30, 0.0 }
 0x1e5   :  { %1086 = vst [vmem:[%s1578_s7 + $0x10] sm:$0xff] %v1058_v32   ;;  %v865_v37 = vadd.f32 %v1529_v58, %v821_v36  ;;  %v880_v40 = vmax.f32 %v864_v33, 0.0 }
 0x1e6   :  { %v883_v39 = vmax.f32 %v867_v35, 0.0 }
 0x1e7   :  { %v881_v41 = vmax.f32 %v865_v37, 0.0 }
 0x1e8   :  { %v1073_v42 = vpack.c.bf16 %v883_v39, %v882_v38 }
 0x1e9   :  { %v1068_v43 = vpack.c.bf16 %v881_v41, %v880_v40  ;;  %v1234_v44 = vpop.f32.mrb[12].mxu1 }
 0x1ea   :  { %1089 = vst [vmem:[%s1578_s7 + $0x28] sm:$0xff] %v1073_v42   ;;  %v870_v45 = vadd.f32 %v1234_v44, %v1529_v58  ;;  %v834_v46 = vpop.f32.mrb[13].mxu1 }
 0x1eb   :  { %1088 = vst [vmem:[%s1578_s7 + $0x20] sm:$0xff] %v1068_v43   ;;  %v868_v47 = vadd.f32 %v1529_v58, %v834_v46  ;;  %v1235_v48 = vpop.f32.mrb[14].mxu1 }
 0x1ec   :  { %v871_v49 = vadd.f32 %v1235_v48, %v1529_v58  ;;  %v837_v50 = vpop.f32.mrb[15].mxu1  ;;  %v886_v52 = vmax.f32 %v870_v45, 0.0 }
 0x1ed   :  { %v869_v51 = vadd.f32 %v1529_v58, %v837_v50  ;;  %v884_v54 = vmax.f32 %v868_v47, 0.0 }
 0x1ee   :  { %v887_v53 = vmax.f32 %v871_v49, 0.0 }
 0x1ef   :  { %v885_v55 = vmax.f32 %v869_v51, 0.0 }
 0x1f0   :  { %v1083_v56 = vpack.c.bf16 %v887_v53, %v886_v52 }
 0x1f1   :  { %v1078_v57 = vpack.c.bf16 %v885_v55, %v884_v54 }
 0x1f2   :  { %1091 = vst [vmem:[%s1578_s7 + $0x38] sm:$0xff] %v1083_v56  }
 0x1f3   :  { %1090 = vst [vmem:[%s1578_s7 + $0x30] sm:$0xff] %v1078_v57  }

</bundles_post_ra>
